<compile_context>
chip_gen: v7x
topology: tpu7x:2x2x1
jax: 0.10.0
libtpu: 0.0.40
codegen_flags: <defaults>
</compile_context>

<pallas_src>
import functools

import jax
import jax.numpy as jnp
from jax.experimental import pallas as pl
from jax.experimental.pallas import tpu as pltpu


def _round_up(n, m):
    return ((n + m - 1) // m) * m


def _tpu_kind():
    try:
        return (jax.devices()[0].device_kind or "").lower()
    except Exception:
        return ""


def _vmem_capacity_bytes(kind):
    try:
        return int(pltpu.get_tpu_info().vmem_capacity_bytes)
    except Exception:
        # v7x has 64 MiB per TensorCore; v5e/v6e have 128 MiB.
        return (64 if "v7" in kind else 128) * 1024 * 1024


# ---------------------------------------------------------------------------
# Kernel 1: LayerNorm + QKV projection + head split, tiled over (batch, seq).
# Emits q/k/v directly in (B, H, N, Dh) bf16 layout -> no host transpose and no
# extra HBM round trip between the two kernels.
# ---------------------------------------------------------------------------
def _ln_qkv_split_kernel(x_ref, lnw_ref, lnb_ref, wqkv_ref,
                         q_ref, k_ref, v_ref, *, eps, num_heads):
    x = x_ref[0]                                          # (T, D) f32
    # centered LayerNorm (no E[x^2]-E[x]^2 cancellation)
    mu = jnp.mean(x, axis=-1, keepdims=True)
    xc = x - mu
    var = jnp.mean(xc * xc, axis=-1, keepdims=True)
    xn = xc * jax.lax.rsqrt(var + eps)
    xn = xn * lnw_ref[...] + lnb_ref[...]                 # broadcast (1, D)

    # QKV projection (qkv_bias=False): bf16 MXU operands, f32 accumulation.
    # Softmax scale is pre-folded into the Q columns of wqkv on the host.
    qkv = jnp.dot(xn.astype(jnp.bfloat16), wqkv_ref[...],
                  preferred_element_type=jnp.float32)     # (T, 3D) f32
    qkv = qkv.astype(q_ref.dtype)                         # single f32->bf16 pass

    D = x.shape[-1]
    Dh = D // num_heads
    for h in range(num_heads):                            # static unroll, stores only
        q_ref[0, h] = qkv[:, 0 * D + h * Dh:0 * D + (h + 1) * Dh]
        k_ref[0, h] = qkv[:, 1 * D + h * Dh:1 * D + (h + 1) * Dh]
        v_ref[0, h] = qkv[:, 2 * D + h * Dh:2 * D + (h + 1) * Dh]


# ---------------------------------------------------------------------------
# Kernel 2: flash-style multi-head attention (online softmax over KV tiles)
#           + single consolidated output projection + residual.
# ---------------------------------------------------------------------------
def _flash_attn_proj_kernel(q_ref, k_ref, v_ref, x_ref, wp_ref, bp_ref, o_ref,
                            m_sc, l_sc, acc_sc, ocat_sc, *,
                            kv_tile, seq_len, n_pad, exp_dtype):
    ki = pl.program_id(2)

    @pl.when(ki == 0)
    def _():
        m_sc[...] = jnp.full(m_sc.shape, -jnp.inf, m_sc.dtype)
        l_sc[...] = jnp.zeros(l_sc.shape, l_sc.dtype)
        acc_sc[...] = jnp.zeros(acc_sc.shape, acc_sc.dtype)

    q = q_ref[0]                                          # (H, TQ, Dh) bf16 (pre-scaled)
    k = k_ref[0]                                          # (H, TKV, Dh) bf16
    # scores: batched over heads, contract on the last axis of both (no k transpose)
    s = jax.lax.dot_general(
        q, k, dimension_numbers=(((2,), (2,)), ((0,), (0,))),
        preferred_element_type=jnp.float32)               # (H, TQ, TKV) f32

    if n_pad != seq_len:
        # mask padded key positions (padding is < one tile, always at the end)
        kv_pos = ki * kv_tile + jax.lax.broadcasted_iota(jnp.int32, s.shape, 2)
        s = jnp.where(kv_pos < seq_len, s, jnp.float32(-1e30))

    m_prev = m_sc[...]
    m_new = jnp.maximum(m_prev, jnp.max(s, axis=-1, keepdims=True))
    alpha = jnp.exp(m_prev - m_new)                       # f32 bookkeeping
    # bf16 exp on v6e/v7x (bf16 EUP, halves p's vreg/VMEM footprint, feeds the PV
    # matmul directly); f32 on v5e (no bf16 VPU/EUP there).
    p = jnp.exp((s - m_new).astype(exp_dtype))
    l_sc[...] = alpha * l_sc[...] + jnp.sum(
        p.astype(jnp.float32), axis=-1, keepdims=True)    # f32 accumulation
    pv = jax.lax.dot_general(
        p.astype(v_ref.dtype), v_ref[0],
        dimension_numbers=(((2,), (1,)), ((0,), (0,))),
        preferred_element_type=jnp.float32)               # (H, TQ, Dh) f32
    acc_sc[...] = alpha * acc_sc[...] + pv
    m_sc[...] = m_new

    @pl.when(ki == pl.num_programs(2) - 1)
    def _():
        H, TQ, Dh = acc_sc.shape
        # softmax denominator via EUP approximate reciprocal (documented approximation;
        # error is well below the bf16 operand noise floor).
        o = acc_sc[...] * pl.reciprocal(l_sc[...], approx=True)    # (H, TQ, Dh) f32
        # pack heads lane-contiguously into a bf16 (TQ, D) scratch, then one K=D
        # projection matmul instead of H separate K=Dh matmuls.
        for h in range(H):                                # static unroll, stores only
            ocat_sc[:, h * Dh:(h + 1) * Dh] = o[h].astype(ocat_sc.dtype)
        y = jnp.dot(ocat_sc[...], wp_ref[...],
                    preferred_element_type=jnp.float32)   # (TQ, D) f32
        y = y + bp_ref[...]
        o_ref[0] = (x_ref[0] + y).astype(o_ref.dtype)     # residual


def block_forward(x, ln_w, ln_b, w_qkv, w_proj, b_proj, *, num_heads=8, eps=1e-5):
    """x: (B, N, D); ln_w/ln_b/b_proj: (D,); w_qkv: (D, 3D); w_proj: (D, D).
    Weights are stored pre-transposed (== PyTorch `linear.weight.T`)."""
    B, N, D = x.shape
    H = num_heads
    assert D % H == 0
    Dh = D // H
    scale = float(Dh) ** -0.5

    # ---- generation-aware tiling & VMEM budget ----
    kind = _tpu_kind()
    vmem_cap = _vmem_capacity_bytes(kind)
    big_vmem = vmem_cap >= 100 * 1024 * 1024              # v5e/v6e 128 MiB vs v7x 64 MiB
    tile_target = 512 if big_vmem else 256
    vmem_limit = (64 if big_vmem else 40) * 1024 * 1024
    use_bf16_exp = ("v6" in kind) or ("v7" in kind)       # v5e keeps f32 exp

    T = min(tile_target, _round_up(N, 8))                 # multiple of 8 always
    N_pad = _round_up(N, T)
    # keep >= 2 parallel grid steps so both v7x TensorCores get work
    if B * (N_pad // T) < 2 and T > 8:
        T = max(8, _round_up(T // 2, 8))
        N_pad = _round_up(N, T)

    x_in = x if N_pad == N else jnp.pad(x, ((0, 0), (0, N_pad - N), (0, 0)))

    # ---- host-side weight prep ----
    # Fold the softmax scale into the Q columns of w_qkv in f32 (exact for any Dh),
    # then cast to bf16 for the MXU (f32 accumulation in-kernel).
    w_qkv_scaled = w_qkv.at[:, :D].multiply(scale)
    wqkv_bf = w_qkv_scaled.astype(jnp.bfloat16)
    wproj_bf = w_proj.astype(jnp.bfloat16)
    lnw2 = ln_w.reshape(1, D)
    lnb2 = ln_b.reshape(1, D)
    bproj2 = b_proj.reshape(1, D)

    cparams2 = pltpu.CompilerParams(
        dimension_semantics=("parallel", "parallel"),
        vmem_limit_bytes=vmem_limit)
    cparams3 = pltpu.CompilerParams(
        dimension_semantics=("parallel", "parallel", "arbitrary"),
        vmem_limit_bytes=vmem_limit)

    # ---- kernel 1: LayerNorm + QKV projection + head split -> (B, H, N_pad, Dh) ----
    qkv_out_shapes = tuple(
        jax.ShapeDtypeStruct((B, H, N_pad, Dh), jnp.bfloat16) for _ in range(3))
    q, k, v = pl.pallas_call(
        functools.partial(_ln_qkv_split_kernel, eps=eps, num_heads=H),
        out_shape=qkv_out_shapes,
        grid=(B, N_pad // T),
        in_specs=[
            pl.BlockSpec((1, T, D), lambda b, i: (b, i, 0)),            # x tile
            pl.BlockSpec((1, D), lambda b, i: (0, 0)),                  # ln weight
            pl.BlockSpec((1, D), lambda b, i: (0, 0)),                  # ln bias
            pl.BlockSpec((D, 3 * D), lambda b, i: (0, 0),               # qkv weight
                         pipeline_mode=pl.Buffered(1)),                 # constant -> single buffer
        ],
        out_specs=[
            pl.BlockSpec((1, H, T, Dh), lambda b, i: (b, 0, i, 0)),     # q
            pl.BlockSpec((1, H, T, Dh), lambda b, i: (b, 0, i, 0)),     # k
            pl.BlockSpec((1, H, T, Dh), lambda b, i: (b, 0, i, 0)),     # v
        ],
        compiler_params=cparams2,
    )(x_in, lnw2, lnb2, wqkv_bf)

    # ---- kernel 2: flash attention + output projection + residual ----
    exp_dtype = jnp.bfloat16 if use_bf16_exp else jnp.float32
    out = pl.pallas_call(
        functools.partial(_flash_attn_proj_kernel,
                          kv_tile=T, seq_len=N, n_pad=N_pad, exp_dtype=exp_dtype),
        out_shape=jax.ShapeDtypeStruct((B, N_pad, D), x.dtype),
        grid=(B, N_pad // T, N_pad // T),
        in_specs=[
            pl.BlockSpec((1, H, T, Dh), lambda b, qi, ki: (b, 0, qi, 0)),   # q
            pl.BlockSpec((1, H, T, Dh), lambda b, qi, ki: (b, 0, ki, 0)),   # k
            pl.BlockSpec((1, H, T, Dh), lambda b, qi, ki: (b, 0, ki, 0)),   # v
            pl.BlockSpec((1, T, D), lambda b, qi, ki: (b, qi, 0)),          # x (residual)
            pl.BlockSpec((D, D), lambda b, qi, ki: (0, 0),                  # proj weight
                         pipeline_mode=pl.Buffered(1)),                     # constant -> single buffer
            pl.BlockSpec((1, D), lambda b, qi, ki: (0, 0)),                 # proj bias
        ],
        out_specs=pl.BlockSpec((1, T, D), lambda b, qi, ki: (b, qi, 0)),
        scratch_shapes=[
            pltpu.VMEM((H, T, 1), jnp.float32),     # running max m
            pltpu.VMEM((H, T, 1), jnp.float32),     # running sum l
            pltpu.VMEM((H, T, Dh), jnp.float32),    # running accumulator
            pltpu.VMEM((T, D), jnp.bfloat16),       # concatenated head outputs (bf16)
        ],
        compiler_params=cparams3,
    )(q, k, v, x_in, wproj_bf, bproj2)

    if N_pad != N:
        out = out[:, :N, :]
    return out


def block_ref(x, ln_w, ln_b, w_qkv, w_proj, b_proj, *, num_heads=8, eps=1e-5):
    """Pure-JAX f32 reference matching the PyTorch forward."""
    B, N, D = x.shape
    Dh = D // num_heads
    mean = x.mean(-1, keepdims=True)
    var = ((x - mean) ** 2).mean(-1, keepdims=True)
    xn = (x - mean) / jnp.sqrt(var + eps) * ln_w + ln_b
    qkv = xn @ w_qkv
    qkv = qkv.reshape(B, N, 3, num_heads, Dh).transpose(2, 0, 3, 1, 4)
    q, k, v = qkv[0], qkv[1], qkv[2]                       # (B, H, N, Dh)
    s = jnp.einsum("bhnd,bhmd->bhnm", q, k) * (Dh ** -0.5)
    p = jax.nn.softmax(s, axis=-1)
    o = jnp.einsum("bhnm,bhmd->bhnd", p, v)
    o = o.transpose(0, 2, 1, 3).reshape(B, N, D)
    y = o @ w_proj + b_proj
    return x + y


if __name__ == "__main__":
    B, N, D, H = 2, 8, 32, 8     # batch, seq_len, in_features, num_attention_heads

    key = jax.random.PRNGKey(0)
    kx, k1, k2, k3, k4, k5 = jax.random.split(key, 6)

    x = jax.random.normal(kx, (B, N, D), dtype=jnp.float32)
    ln_w = 1.0 + 0.1 * jax.random.normal(k1, (D,), jnp.float32)
    ln_b = 0.1 * jax.random.normal(k2, (D,), jnp.float32)
    w_qkv = jax.random.normal(k3, (D, 3 * D), jnp.float32) / jnp.sqrt(D)
    w_proj = jax.random.normal(k4, (D, D), jnp.float32) / jnp.sqrt(D)
    b_proj = 0.1 * jax.random.normal(k5, (D,), jnp.float32)

    out = block_forward(x, ln_w, ln_b, w_qkv, w_proj, b_proj, num_heads=H)
    out = jax.block_until_ready(out)

    ref = block_ref(x, ln_w, ln_b, w_qkv, w_proj, b_proj, num_heads=H)
    assert out.shape == (B, N, D)
    # bf16 MXU operands (+ optional bf16 exp) + approx reciprocal -> loose tolerance.
    assert jnp.allclose(out, ref, atol=5e-2, rtol=5e-2), "mismatch vs reference"

    print("KERNEL_OK")
</pallas_src>

<mosaic_0001>
module attributes {stable_mosaic.version = 11 : i64} {
  func.func @_ln_qkv_split_kernel(%arg0: i32, %arg1: i32, %arg2: memref<1x8x32xf32, #tpu.memory_space<vmem>>, %arg3: memref<1x32xf32, #tpu.memory_space<vmem>>, %arg4: memref<1x32xf32, #tpu.memory_space<vmem>>, %arg5: memref<32x96xbf16, #tpu.memory_space<vmem>>, %arg6: memref<1x8x8x4xbf16, #tpu.memory_space<vmem>>, %arg7: memref<1x8x8x4xbf16, #tpu.memory_space<vmem>>, %arg8: memref<1x8x8x4xbf16, #tpu.memory_space<vmem>>) attributes {dimension_semantics = [#tpu.dimension_semantics<parallel>, #tpu.dimension_semantics<parallel>], iteration_bounds = array<i64: 2, 1>, scalar_prefetch = 0 : i64, scratch_operands = 0 : i64, tpu.core_type = #tpu.core_type<tc>, window_params = [{transform_indices = @transform_0, window_bounds = array<i64: 1, 8, 32>}, {pipeline_mode = #tpu.pipeline_mode<synchronous>, transform_indices = @transform_1, window_bounds = array<i64: 1, 32>}, {pipeline_mode = #tpu.pipeline_mode<synchronous>, transform_indices = @transform_2, window_bounds = array<i64: 1, 32>}, {pipeline_mode = #tpu.pipeline_mode<synchronous>, transform_indices = @transform_3, window_bounds = array<i64: 32, 96>}, {transform_indices = @transform_4, window_bounds = array<i64: 1, 8, 8, 4>}, {transform_indices = @transform_5, window_bounds = array<i64: 1, 8, 8, 4>}, {transform_indices = @transform_6, window_bounds = array<i64: 1, 8, 8, 4>}]} {
    %c0 = arith.constant 0 : index
    %c0_0 = arith.constant 0 : index
    %c0_1 = arith.constant 0 : index
    %0 = vector.load %arg2[%c0, %c0_0, %c0_1] : memref<1x8x32xf32, #tpu.memory_space<vmem>>, vector<1x8x32xf32>
    %1 = vector.shape_cast %0 : vector<1x8x32xf32> to vector<8x32xf32>
    %cst = arith.constant dense<0.000000e+00> : vector<8xf32>
    %2 = vector.multi_reduction <add>, %1, %cst [1] : vector<8x32xf32> to vector<8xf32>
    %3 = vector.shape_cast %2 : vector<8xf32> to vector<8x1xf32>
    %cst_2 = arith.constant 3.200000e+01 : f32
    %4 = vector.broadcast %cst_2 : f32 to vector<8x1xf32>
    %5 = arith.divf %3, %4 : vector<8x1xf32>
    %6 = vector.broadcast %5 : vector<8x1xf32> to vector<8x32xf32>
    %7 = arith.subf %1, %6 : vector<8x32xf32>
    %8 = arith.mulf %7, %7 : vector<8x32xf32>
    %cst_3 = arith.constant dense<0.000000e+00> : vector<8xf32>
    %9 = vector.multi_reduction <add>, %8, %cst_3 [1] : vector<8x32xf32> to vector<8xf32>
    %10 = vector.shape_cast %9 : vector<8xf32> to vector<8x1xf32>
    %cst_4 = arith.constant 3.200000e+01 : f32
    %11 = vector.broadcast %cst_4 : f32 to vector<8x1xf32>
    %12 = arith.divf %10, %11 : vector<8x1xf32>
    %cst_5 = arith.constant 9.99999974E-6 : f32
    %13 = vector.broadcast %cst_5 : f32 to vector<8x1xf32>
    %14 = arith.addf %12, %13 : vector<8x1xf32>
    %15 = math.rsqrt %14 : vector<8x1xf32>
    %16 = vector.broadcast %15 : vector<8x1xf32> to vector<8x32xf32>
    %17 = arith.mulf %7, %16 : vector<8x32xf32>
    %c0_6 = arith.constant 0 : index
    %c0_7 = arith.constant 0 : index
    %18 = vector.load %arg3[%c0_6, %c0_7] : memref<1x32xf32, #tpu.memory_space<vmem>>, vector<1x32xf32>
    %19 = vector.broadcast %18 : vector<1x32xf32> to vector<8x32xf32>
    %20 = arith.mulf %17, %19 : vector<8x32xf32>
    %c0_8 = arith.constant 0 : index
    %c0_9 = arith.constant 0 : index
    %21 = vector.load %arg4[%c0_8, %c0_9] : memref<1x32xf32, #tpu.memory_space<vmem>>, vector<1x32xf32>
    %22 = vector.broadcast %21 : vector<1x32xf32> to vector<8x32xf32>
    %23 = arith.addf %20, %22 : vector<8x32xf32>
    %24 = arith.truncf %23 : vector<8x32xf32> to vector<8x32xbf16>
    %c0_10 = arith.constant 0 : index
    %c0_11 = arith.constant 0 : index
    %25 = vector.load %arg5[%c0_10, %c0_11] : memref<32x96xbf16, #tpu.memory_space<vmem>>, vector<32x96xbf16>
    %cst_12 = arith.constant dense<0.000000e+00> : vector<8x96xf32>
    %26 = tpu.matmul %24, %25, %cst_12 {dimension_numbers = #tpu.dot_dimension_numbers<[1], [0], [0], [1], [0, 0, 1, 1], [], []>} : vector<8x32xbf16>, vector<32x96xbf16>, vector<8x96xf32> -> vector<8x96xf32>
    %27 = arith.truncf %26 : vector<8x96xf32> to vector<8x96xbf16>
    %28 = vector.extract_strided_slice %27 {offsets = [0, 0], sizes = [8, 4], strides = [1, 1]} : vector<8x96xbf16> to vector<8x4xbf16>
    %c0_13 = arith.constant 0 : index
    %c0_14 = arith.constant 0 : index
    %c0_15 = arith.constant 0 : index
    %c0_16 = arith.constant 0 : index
    %29 = vector.load %arg6[%c0_13, %c0_14, %c0_15, %c0_16] : memref<1x8x8x4xbf16, #tpu.memory_space<vmem>>, vector<1x1x8x4xbf16>
    %30 = vector.shape_cast %29 : vector<1x1x8x4xbf16> to vector<8x4xbf16>
    %31 = vector.shape_cast %28 : vector<8x4xbf16> to vector<1x1x8x4xbf16>
    tpu.vector_store %arg6[%c0_13, %c0_14, %c0_15, %c0_16], %31 {strides = array<i32>} : memref<1x8x8x4xbf16, #tpu.memory_space<vmem>>, vector<1x1x8x4xbf16>,
    %32 = vector.extract_strided_slice %27 {offsets = [0, 32], sizes = [8, 4], strides = [1, 1]} : vector<8x96xbf16> to vector<8x4xbf16>
    %c0_17 = arith.constant 0 : index
    %c0_18 = arith.constant 0 : index
    %c0_19 = arith.constant 0 : index
    %c0_20 = arith.constant 0 : index
    %33 = vector.load %arg7[%c0_17, %c0_18, %c0_19, %c0_20] : memref<1x8x8x4xbf16, #tpu.memory_space<vmem>>, vector<1x1x8x4xbf16>
    %34 = vector.shape_cast %33 : vector<1x1x8x4xbf16> to vector<8x4xbf16>
    %35 = vector.shape_cast %32 : vector<8x4xbf16> to vector<1x1x8x4xbf16>
    tpu.vector_store %arg7[%c0_17, %c0_18, %c0_19, %c0_20], %35 {strides = array<i32>} : memref<1x8x8x4xbf16, #tpu.memory_space<vmem>>, vector<1x1x8x4xbf16>,
    %36 = vector.extract_strided_slice %27 {offsets = [0, 64], sizes = [8, 4], strides = [1, 1]} : vector<8x96xbf16> to vector<8x4xbf16>
    %c0_21 = arith.constant 0 : index
    %c0_22 = arith.constant 0 : index
    %c0_23 = arith.constant 0 : index
    %c0_24 = arith.constant 0 : index
    %37 = vector.load %arg8[%c0_21, %c0_22, %c0_23, %c0_24] : memref<1x8x8x4xbf16, #tpu.memory_space<vmem>>, vector<1x1x8x4xbf16>
    %38 = vector.shape_cast %37 : vector<1x1x8x4xbf16> to vector<8x4xbf16>
    %39 = vector.shape_cast %36 : vector<8x4xbf16> to vector<1x1x8x4xbf16>
    tpu.vector_store %arg8[%c0_21, %c0_22, %c0_23, %c0_24], %39 {strides = array<i32>} : memref<1x8x8x4xbf16, #tpu.memory_space<vmem>>, vector<1x1x8x4xbf16>,
    %40 = vector.extract_strided_slice %27 {offsets = [0, 4], sizes = [8, 4], strides = [1, 1]} : vector<8x96xbf16> to vector<8x4xbf16>
    %c0_25 = arith.constant 0 : index
    %c1 = arith.constant 1 : index
    %c0_26 = arith.constant 0 : index
    %c0_27 = arith.constant 0 : index
    %41 = vector.load %arg6[%c0_25, %c1, %c0_26, %c0_27] : memref<1x8x8x4xbf16, #tpu.memory_space<vmem>>, vector<1x1x8x4xbf16>
    %42 = vector.shape_cast %41 : vector<1x1x8x4xbf16> to vector<8x4xbf16>
    %43 = vector.shape_cast %40 : vector<8x4xbf16> to vector<1x1x8x4xbf16>
    tpu.vector_store %arg6[%c0_25, %c1, %c0_26, %c0_27], %43 {strides = array<i32>} : memref<1x8x8x4xbf16, #tpu.memory_space<vmem>>, vector<1x1x8x4xbf16>,
    %44 = vector.extract_strided_slice %27 {offsets = [0, 36], sizes = [8, 4], strides = [1, 1]} : vector<8x96xbf16> to vector<8x4xbf16>
    %c0_28 = arith.constant 0 : index
    %c1_29 = arith.constant 1 : index
    %c0_30 = arith.constant 0 : index
    %c0_31 = arith.constant 0 : index
    %45 = vector.load %arg7[%c0_28, %c1_29, %c0_30, %c0_31] : memref<1x8x8x4xbf16, #tpu.memory_space<vmem>>, vector<1x1x8x4xbf16>
    %46 = vector.shape_cast %45 : vector<1x1x8x4xbf16> to vector<8x4xbf16>
    %47 = vector.shape_cast %44 : vector<8x4xbf16> to vector<1x1x8x4xbf16>
    tpu.vector_store %arg7[%c0_28, %c1_29, %c0_30, %c0_31], %47 {strides = array<i32>} : memref<1x8x8x4xbf16, #tpu.memory_space<vmem>>, vector<1x1x8x4xbf16>,
    %48 = vector.extract_strided_slice %27 {offsets = [0, 68], sizes = [8, 4], strides = [1, 1]} : vector<8x96xbf16> to vector<8x4xbf16>
    %c0_32 = arith.constant 0 : index
    %c1_33 = arith.constant 1 : index
    %c0_34 = arith.constant 0 : index
    %c0_35 = arith.constant 0 : index
    %49 = vector.load %arg8[%c0_32, %c1_33, %c0_34, %c0_35] : memref<1x8x8x4xbf16, #tpu.memory_space<vmem>>, vector<1x1x8x4xbf16>
    %50 = vector.shape_cast %49 : vector<1x1x8x4xbf16> to vector<8x4xbf16>
    %51 = vector.shape_cast %48 : vector<8x4xbf16> to vector<1x1x8x4xbf16>
    tpu.vector_store %arg8[%c0_32, %c1_33, %c0_34, %c0_35], %51 {strides = array<i32>} : memref<1x8x8x4xbf16, #tpu.memory_space<vmem>>, vector<1x1x8x4xbf16>,
    %52 = vector.extract_strided_slice %27 {offsets = [0, 8], sizes = [8, 4], strides = [1, 1]} : vector<8x96xbf16> to vector<8x4xbf16>
    %c0_36 = arith.constant 0 : index
    %c2 = arith.constant 2 : index
    %c0_37 = arith.constant 0 : index
    %c0_38 = arith.constant 0 : index
    %53 = vector.load %arg6[%c0_36, %c2, %c0_37, %c0_38] : memref<1x8x8x4xbf16, #tpu.memory_space<vmem>>, vector<1x1x8x4xbf16>
    %54 = vector.shape_cast %53 : vector<1x1x8x4xbf16> to vector<8x4xbf16>
    %55 = vector.shape_cast %52 : vector<8x4xbf16> to vector<1x1x8x4xbf16>
    tpu.vector_store %arg6[%c0_36, %c2, %c0_37, %c0_38], %55 {strides = array<i32>} : memref<1x8x8x4xbf16, #tpu.memory_space<vmem>>, vector<1x1x8x4xbf16>,
    %56 = vector.extract_strided_slice %27 {offsets = [0, 40], sizes = [8, 4], strides = [1, 1]} : vector<8x96xbf16> to vector<8x4xbf16>
    %c0_39 = arith.constant 0 : index
    %c2_40 = arith.constant 2 : index
    %c0_41 = arith.constant 0 : index
    %c0_42 = arith.constant 0 : index
    %57 = vector.load %arg7[%c0_39, %c2_40, %c0_41, %c0_42] : memref<1x8x8x4xbf16, #tpu.memory_space<vmem>>, vector<1x1x8x4xbf16>
    %58 = vector.shape_cast %57 : vector<1x1x8x4xbf16> to vector<8x4xbf16>
    %59 = vector.shape_cast %56 : vector<8x4xbf16> to vector<1x1x8x4xbf16>
    tpu.vector_store %arg7[%c0_39, %c2_40, %c0_41, %c0_42], %59 {strides = array<i32>} : memref<1x8x8x4xbf16, #tpu.memory_space<vmem>>, vector<1x1x8x4xbf16>,
    %60 = vector.extract_strided_slice %27 {offsets = [0, 72], sizes = [8, 4], strides = [1, 1]} : vector<8x96xbf16> to vector<8x4xbf16>
    %c0_43 = arith.constant 0 : index
    %c2_44 = arith.constant 2 : index
    %c0_45 = arith.constant 0 : index
    %c0_46 = arith.constant 0 : index
    %61 = vector.load %arg8[%c0_43, %c2_44, %c0_45, %c0_46] : memref<1x8x8x4xbf16, #tpu.memory_space<vmem>>, vector<1x1x8x4xbf16>
    %62 = vector.shape_cast %61 : vector<1x1x8x4xbf16> to vector<8x4xbf16>
    %63 = vector.shape_cast %60 : vector<8x4xbf16> to vector<1x1x8x4xbf16>
    tpu.vector_store %arg8[%c0_43, %c2_44, %c0_45, %c0_46], %63 {strides = array<i32>} : memref<1x8x8x4xbf16, #tpu.memory_space<vmem>>, vector<1x1x8x4xbf16>,
    %64 = vector.extract_strided_slice %27 {offsets = [0, 12], sizes = [8, 4], strides = [1, 1]} : vector<8x96xbf16> to vector<8x4xbf16>
    %c0_47 = arith.constant 0 : index
    %c3 = arith.constant 3 : index
    %c0_48 = arith.constant 0 : index
    %c0_49 = arith.constant 0 : index
    %65 = vector.load %arg6[%c0_47, %c3, %c0_48, %c0_49] : memref<1x8x8x4xbf16, #tpu.memory_space<vmem>>, vector<1x1x8x4xbf16>
    %66 = vector.shape_cast %65 : vector<1x1x8x4xbf16> to vector<8x4xbf16>
    %67 = vector.shape_cast %64 : vector<8x4xbf16> to vector<1x1x8x4xbf16>
    tpu.vector_store %arg6[%c0_47, %c3, %c0_48, %c0_49], %67 {strides = array<i32>} : memref<1x8x8x4xbf16, #tpu.memory_space<vmem>>, vector<1x1x8x4xbf16>,
    %68 = vector.extract_strided_slice %27 {offsets = [0, 44], sizes = [8, 4], strides = [1, 1]} : vector<8x96xbf16> to vector<8x4xbf16>
    %c0_50 = arith.constant 0 : index
    %c3_51 = arith.constant 3 : index
    %c0_52 = arith.constant 0 : index
    %c0_53 = arith.constant 0 : index
    %69 = vector.load %arg7[%c0_50, %c3_51, %c0_52, %c0_53] : memref<1x8x8x4xbf16, #tpu.memory_space<vmem>>, vector<1x1x8x4xbf16>
    %70 = vector.shape_cast %69 : vector<1x1x8x4xbf16> to vector<8x4xbf16>
    %71 = vector.shape_cast %68 : vector<8x4xbf16> to vector<1x1x8x4xbf16>
    tpu.vector_store %arg7[%c0_50, %c3_51, %c0_52, %c0_53], %71 {strides = array<i32>} : memref<1x8x8x4xbf16, #tpu.memory_space<vmem>>, vector<1x1x8x4xbf16>,
    %72 = vector.extract_strided_slice %27 {offsets = [0, 76], sizes = [8, 4], strides = [1, 1]} : vector<8x96xbf16> to vector<8x4xbf16>
    %c0_54 = arith.constant 0 : index
    %c3_55 = arith.constant 3 : index
    %c0_56 = arith.constant 0 : index
    %c0_57 = arith.constant 0 : index
    %73 = vector.load %arg8[%c0_54, %c3_55, %c0_56, %c0_57] : memref<1x8x8x4xbf16, #tpu.memory_space<vmem>>, vector<1x1x8x4xbf16>
    %74 = vector.shape_cast %73 : vector<1x1x8x4xbf16> to vector<8x4xbf16>
    %75 = vector.shape_cast %72 : vector<8x4xbf16> to vector<1x1x8x4xbf16>
    tpu.vector_store %arg8[%c0_54, %c3_55, %c0_56, %c0_57], %75 {strides = array<i32>} : memref<1x8x8x4xbf16, #tpu.memory_space<vmem>>, vector<1x1x8x4xbf16>,
    %76 = vector.extract_strided_slice %27 {offsets = [0, 16], sizes = [8, 4], strides = [1, 1]} : vector<8x96xbf16> to vector<8x4xbf16>
    %c0_58 = arith.constant 0 : index
    %c4 = arith.constant 4 : index
    %c0_59 = arith.constant 0 : index
    %c0_60 = arith.constant 0 : index
    %77 = vector.load %arg6[%c0_58, %c4, %c0_59, %c0_60] : memref<1x8x8x4xbf16, #tpu.memory_space<vmem>>, vector<1x1x8x4xbf16>
    %78 = vector.shape_cast %77 : vector<1x1x8x4xbf16> to vector<8x4xbf16>
    %79 = vector.shape_cast %76 : vector<8x4xbf16> to vector<1x1x8x4xbf16>
    tpu.vector_store %arg6[%c0_58, %c4, %c0_59, %c0_60], %79 {strides = array<i32>} : memref<1x8x8x4xbf16, #tpu.memory_space<vmem>>, vector<1x1x8x4xbf16>,
    %80 = vector.extract_strided_slice %27 {offsets = [0, 48], sizes = [8, 4], strides = [1, 1]} : vector<8x96xbf16> to vector<8x4xbf16>
    %c0_61 = arith.constant 0 : index
    %c4_62 = arith.constant 4 : index
    %c0_63 = arith.constant 0 : index
    %c0_64 = arith.constant 0 : index
    %81 = vector.load %arg7[%c0_61, %c4_62, %c0_63, %c0_64] : memref<1x8x8x4xbf16, #tpu.memory_space<vmem>>, vector<1x1x8x4xbf16>
    %82 = vector.shape_cast %81 : vector<1x1x8x4xbf16> to vector<8x4xbf16>
    %83 = vector.shape_cast %80 : vector<8x4xbf16> to vector<1x1x8x4xbf16>
    tpu.vector_store %arg7[%c0_61, %c4_62, %c0_63, %c0_64], %83 {strides = array<i32>} : memref<1x8x8x4xbf16, #tpu.memory_space<vmem>>, vector<1x1x8x4xbf16>,
    %84 = vector.extract_strided_slice %27 {offsets = [0, 80], sizes = [8, 4], strides = [1, 1]} : vector<8x96xbf16> to vector<8x4xbf16>
    %c0_65 = arith.constant 0 : index
    %c4_66 = arith.constant 4 : index
    %c0_67 = arith.constant 0 : index
    %c0_68 = arith.constant 0 : index
    %85 = vector.load %arg8[%c0_65, %c4_66, %c0_67, %c0_68] : memref<1x8x8x4xbf16, #tpu.memory_space<vmem>>, vector<1x1x8x4xbf16>
    %86 = vector.shape_cast %85 : vector<1x1x8x4xbf16> to vector<8x4xbf16>
    %87 = vector.shape_cast %84 : vector<8x4xbf16> to vector<1x1x8x4xbf16>
    tpu.vector_store %arg8[%c0_65, %c4_66, %c0_67, %c0_68], %87 {strides = array<i32>} : memref<1x8x8x4xbf16, #tpu.memory_space<vmem>>, vector<1x1x8x4xbf16>,
    %88 = vector.extract_strided_slice %27 {offsets = [0, 20], sizes = [8, 4], strides = [1, 1]} : vector<8x96xbf16> to vector<8x4xbf16>
    %c0_69 = arith.constant 0 : index
    %c5 = arith.constant 5 : index
    %c0_70 = arith.constant 0 : index
    %c0_71 = arith.constant 0 : index
    %89 = vector.load %arg6[%c0_69, %c5, %c0_70, %c0_71] : memref<1x8x8x4xbf16, #tpu.memory_space<vmem>>, vector<1x1x8x4xbf16>
    %90 = vector.shape_cast %89 : vector<1x1x8x4xbf16> to vector<8x4xbf16>
    %91 = vector.shape_cast %88 : vector<8x4xbf16> to vector<1x1x8x4xbf16>
    tpu.vector_store %arg6[%c0_69, %c5, %c0_70, %c0_71], %91 {strides = array<i32>} : memref<1x8x8x4xbf16, #tpu.memory_space<vmem>>, vector<1x1x8x4xbf16>,
    %92 = vector.extract_strided_slice %27 {offsets = [0, 52], sizes = [8, 4], strides = [1, 1]} : vector<8x96xbf16> to vector<8x4xbf16>
    %c0_72 = arith.constant 0 : index
    %c5_73 = arith.constant 5 : index
    %c0_74 = arith.constant 0 : index
    %c0_75 = arith.constant 0 : index
    %93 = vector.load %arg7[%c0_72, %c5_73, %c0_74, %c0_75] : memref<1x8x8x4xbf16, #tpu.memory_space<vmem>>, vector<1x1x8x4xbf16>
    %94 = vector.shape_cast %93 : vector<1x1x8x4xbf16> to vector<8x4xbf16>
    %95 = vector.shape_cast %92 : vector<8x4xbf16> to vector<1x1x8x4xbf16>
    tpu.vector_store %arg7[%c0_72, %c5_73, %c0_74, %c0_75], %95 {strides = array<i32>} : memref<1x8x8x4xbf16, #tpu.memory_space<vmem>>, vector<1x1x8x4xbf16>,
    %96 = vector.extract_strided_slice %27 {offsets = [0, 84], sizes = [8, 4], strides = [1, 1]} : vector<8x96xbf16> to vector<8x4xbf16>
    %c0_76 = arith.constant 0 : index
    %c5_77 = arith.constant 5 : index
    %c0_78 = arith.constant 0 : index
    %c0_79 = arith.constant 0 : index
    %97 = vector.load %arg8[%c0_76, %c5_77, %c0_78, %c0_79] : memref<1x8x8x4xbf16, #tpu.memory_space<vmem>>, vector<1x1x8x4xbf16>
    %98 = vector.shape_cast %97 : vector<1x1x8x4xbf16> to vector<8x4xbf16>
    %99 = vector.shape_cast %96 : vector<8x4xbf16> to vector<1x1x8x4xbf16>
    tpu.vector_store %arg8[%c0_76, %c5_77, %c0_78, %c0_79], %99 {strides = array<i32>} : memref<1x8x8x4xbf16, #tpu.memory_space<vmem>>, vector<1x1x8x4xbf16>,
    %100 = vector.extract_strided_slice %27 {offsets = [0, 24], sizes = [8, 4], strides = [1, 1]} : vector<8x96xbf16> to vector<8x4xbf16>
    %c0_80 = arith.constant 0 : index
    %c6 = arith.constant 6 : index
    %c0_81 = arith.constant 0 : index
    %c0_82 = arith.constant 0 : index
    %101 = vector.load %arg6[%c0_80, %c6, %c0_81, %c0_82] : memref<1x8x8x4xbf16, #tpu.memory_space<vmem>>, vector<1x1x8x4xbf16>
    %102 = vector.shape_cast %101 : vector<1x1x8x4xbf16> to vector<8x4xbf16>
    %103 = vector.shape_cast %100 : vector<8x4xbf16> to vector<1x1x8x4xbf16>
    tpu.vector_store %arg6[%c0_80, %c6, %c0_81, %c0_82], %103 {strides = array<i32>} : memref<1x8x8x4xbf16, #tpu.memory_space<vmem>>, vector<1x1x8x4xbf16>,
    %104 = vector.extract_strided_slice %27 {offsets = [0, 56], sizes = [8, 4], strides = [1, 1]} : vector<8x96xbf16> to vector<8x4xbf16>
    %c0_83 = arith.constant 0 : index
    %c6_84 = arith.constant 6 : index
    %c0_85 = arith.constant 0 : index
    %c0_86 = arith.constant 0 : index
    %105 = vector.load %arg7[%c0_83, %c6_84, %c0_85, %c0_86] : memref<1x8x8x4xbf16, #tpu.memory_space<vmem>>, vector<1x1x8x4xbf16>
    %106 = vector.shape_cast %105 : vector<1x1x8x4xbf16> to vector<8x4xbf16>
    %107 = vector.shape_cast %104 : vector<8x4xbf16> to vector<1x1x8x4xbf16>
    tpu.vector_store %arg7[%c0_83, %c6_84, %c0_85, %c0_86], %107 {strides = array<i32>} : memref<1x8x8x4xbf16, #tpu.memory_space<vmem>>, vector<1x1x8x4xbf16>,
    %108 = vector.extract_strided_slice %27 {offsets = [0, 88], sizes = [8, 4], strides = [1, 1]} : vector<8x96xbf16> to vector<8x4xbf16>
    %c0_87 = arith.constant 0 : index
    %c6_88 = arith.constant 6 : index
    %c0_89 = arith.constant 0 : index
    %c0_90 = arith.constant 0 : index
    %109 = vector.load %arg8[%c0_87, %c6_88, %c0_89, %c0_90] : memref<1x8x8x4xbf16, #tpu.memory_space<vmem>>, vector<1x1x8x4xbf16>
    %110 = vector.shape_cast %109 : vector<1x1x8x4xbf16> to vector<8x4xbf16>
    %111 = vector.shape_cast %108 : vector<8x4xbf16> to vector<1x1x8x4xbf16>
    tpu.vector_store %arg8[%c0_87, %c6_88, %c0_89, %c0_90], %111 {strides = array<i32>} : memref<1x8x8x4xbf16, #tpu.memory_space<vmem>>, vector<1x1x8x4xbf16>,
    %112 = vector.extract_strided_slice %27 {offsets = [0, 28], sizes = [8, 4], strides = [1, 1]} : vector<8x96xbf16> to vector<8x4xbf16>
    %c0_91 = arith.constant 0 : index
    %c7 = arith.constant 7 : index
    %c0_92 = arith.constant 0 : index
    %c0_93 = arith.constant 0 : index
    %113 = vector.load %arg6[%c0_91, %c7, %c0_92, %c0_93] : memref<1x8x8x4xbf16, #tpu.memory_space<vmem>>, vector<1x1x8x4xbf16>
    %114 = vector.shape_cast %113 : vector<1x1x8x4xbf16> to vector<8x4xbf16>
    %115 = vector.shape_cast %112 : vector<8x4xbf16> to vector<1x1x8x4xbf16>
    tpu.vector_store %arg6[%c0_91, %c7, %c0_92, %c0_93], %115 {strides = array<i32>} : memref<1x8x8x4xbf16, #tpu.memory_space<vmem>>, vector<1x1x8x4xbf16>,
    %116 = vector.extract_strided_slice %27 {offsets = [0, 60], sizes = [8, 4], strides = [1, 1]} : vector<8x96xbf16> to vector<8x4xbf16>
    %c0_94 = arith.constant 0 : index
    %c7_95 = arith.constant 7 : index
    %c0_96 = arith.constant 0 : index
    %c0_97 = arith.constant 0 : index
    %117 = vector.load %arg7[%c0_94, %c7_95, %c0_96, %c0_97] : memref<1x8x8x4xbf16, #tpu.memory_space<vmem>>, vector<1x1x8x4xbf16>
    %118 = vector.shape_cast %117 : vector<1x1x8x4xbf16> to vector<8x4xbf16>
    %119 = vector.shape_cast %116 : vector<8x4xbf16> to vector<1x1x8x4xbf16>
    tpu.vector_store %arg7[%c0_94, %c7_95, %c0_96, %c0_97], %119 {strides = array<i32>} : memref<1x8x8x4xbf16, #tpu.memory_space<vmem>>, vector<1x1x8x4xbf16>,
    %120 = vector.extract_strided_slice %27 {offsets = [0, 92], sizes = [8, 4], strides = [1, 1]} : vector<8x96xbf16> to vector<8x4xbf16>
    %c0_98 = arith.constant 0 : index
    %c7_99 = arith.constant 7 : index
    %c0_100 = arith.constant 0 : index
    %c0_101 = arith.constant 0 : index
    %121 = vector.load %arg8[%c0_98, %c7_99, %c0_100, %c0_101] : memref<1x8x8x4xbf16, #tpu.memory_space<vmem>>, vector<1x1x8x4xbf16>
    %122 = vector.shape_cast %121 : vector<1x1x8x4xbf16> to vector<8x4xbf16>
    %123 = vector.shape_cast %120 : vector<8x4xbf16> to vector<1x1x8x4xbf16>
    tpu.vector_store %arg8[%c0_98, %c7_99, %c0_100, %c0_101], %123 {strides = array<i32>} : memref<1x8x8x4xbf16, #tpu.memory_space<vmem>>, vector<1x1x8x4xbf16>,
    return
  }
  func.func @transform_0(%arg0: i32, %arg1: i32) -> (i32, i32, i32) {
    %c0_i32 = arith.constant 0 : i32
    %c0_i32_0 = arith.constant 0 : i32
    return %arg0, %arg1, %c0_i32 : i32, i32, i32
  }
  func.func @transform_1(%arg0: i32, %arg1: i32) -> (i32, i32) {
    %c0_i32 = arith.constant 0 : i32
    %c0_i32_0 = arith.constant 0 : i32
    %c0_i32_1 = arith.constant 0 : i32
    return %c0_i32, %c0_i32_0 : i32, i32
  }
  func.func @transform_2(%arg0: i32, %arg1: i32) -> (i32, i32) {
    %c0_i32 = arith.constant 0 : i32
    %c0_i32_0 = arith.constant 0 : i32
    %c0_i32_1 = arith.constant 0 : i32
    return %c0_i32, %c0_i32_0 : i32, i32
  }
  func.func @transform_3(%arg0: i32, %arg1: i32) -> (i32, i32) {
    %c0_i32 = arith.constant 0 : i32
    %c0_i32_0 = arith.constant 0 : i32
    %c0_i32_1 = arith.constant 0 : i32
    return %c0_i32, %c0_i32_0 : i32, i32
  }
  func.func @transform_4(%arg0: i32, %arg1: i32) -> (i32, i32, i32, i32) {
    %c0_i32 = arith.constant 0 : i32
    %c0_i32_0 = arith.constant 0 : i32
    %c0_i32_1 = arith.constant 0 : i32
    return %arg0, %c0_i32, %arg1, %c0_i32_0 : i32, i32, i32, i32
  }
  func.func @transform_5(%arg0: i32, %arg1: i32) -> (i32, i32, i32, i32) {
    %c0_i32 = arith.constant 0 : i32
    %c0_i32_0 = arith.constant 0 : i32
    %c0_i32_1 = arith.constant 0 : i32
    return %arg0, %c0_i32, %arg1, %c0_i32_0 : i32, i32, i32, i32
  }
  func.func @transform_6(%arg0: i32, %arg1: i32) -> (i32, i32, i32, i32) {
    %c0_i32 = arith.constant 0 : i32
    %c0_i32_0 = arith.constant 0 : i32
    %c0_i32_1 = arith.constant 0 : i32
    return %arg0, %c0_i32, %arg1, %c0_i32_0 : i32, i32, i32, i32
  }
}

</mosaic_0001>

<bundles_post_ra>
// kernel: tpu_custom_call.1
= control target key start
LH: loop header
LB: loop body
LE: loop exit
PB: predicated region body
PF: predicated region fallthrough
CT: control target
= control target key end

     0   :  { %s1753_s0 = inlined_call_operand.hbm [shape: f32[2,8,32], index: 0, kind: input, shape index: {}]   ;;  %s1754_s1 = inlined_call_operand.hbm [shape: f32[1,32], index: 1, kind: input, shape index: {}]   ;;  %s1755_s2 = inlined_call_operand.hbm [shape: f32[1,32], index: 2, kind: input, shape index: {}]   ;;  %s1756_s3 = inlined_call_operand.hbm [shape: bf16[32,96], index: 3, kind: input, shape index: {}]   ;;  %s1757_s4 = inlined_call_operand.hbm [shape: bf16[2,8,8,4], index: 4, kind: output, shape index: {0}]   ;;  %s1758_s5 = inlined_call_operand.hbm [shape: bf16[2,8,8,4], index: 5, kind: output, shape index: {1}]   ;;  %s1759_s6 = inlined_call_operand.hbm [shape: bf16[2,8,8,4], index: 6, kind: output, shape index: {2}]  }
   0x1   :  { %1766 = sst [smem:[#allocation19_spill]] %s1753_s0 }
   0x2   :  { %12 = vsyncpa [#allocation3], 0 }
   0x3   :  { %14 = vsyncpa [#allocation3 + $0x1], 0 }
   0x4   :  { %15 = vsyncpa [#allocation6], 0 }
   0x5   :  { %16 = vsyncpa [#allocation9], 0 }
   0x6   :  { %17 = vsyncpa [#allocation4], 0 }
   0x7   :  { %19 = vsyncpa [#allocation4 + $0x1], 0 }
   0x8   :  { %20 = vsyncpa [#allocation12], 0 }
   0x9   :  { %22 = vsyncpa [#allocation12 + $0x1], 0  ;;  %s1336_s21 = smov 0   ;;  %s1338_s22 = smov 0  }
   0xa   :  { %s1340_s23 = smov 0   ;;  %s1342_s24 = smov 0  }
   0xb   :  { %s1344_s25 = smov 0   ;;  %s1346_s26 = smov 0  }
   0xc LB: > { %s1367_s27 = sadd.s32 4294967295, %s1264_s26   ;;  %s1763_s28 = sadd.s32 4294967294, %s1264_s26   ;;  %s1264_s26 = sphi %s1346_s26, %s28_s26   ;;  %s1260_s25 = sphi %s1344_s25, %s1791_s25   ;;  %s1256_s24 = sphi %s1342_s24, %s1790_s24   ;;  %s1252_s23 = sphi %s1340_s23, %s1789_s23   ;;  %s1248_s22 = sphi %s1338_s22, %s1788_s22   ;;  %s1244_s21 = sphi %s1336_s21, %s1787_s21  }
   0xd   : > { %p62_p0 = scmp.ne.s32.totalorder %s1248_s22, %s1244_s21  ;;  %p1760_p1 = scmp.eq.s32.totalorder %s1367_s27, 0 }
   0xe   : > { %p157_p3 = scmp.eq.s32.totalorder %s1763_s28, 1  ;;  %p797_p5 = scmp.ge.s32.totalorder %s1264_s26, 1 }
   0xf   : > { %p1378_p4 = por %p1760_p1, %p62_p0  ;;  %p220_p7 = scmp.lt.s32.totalorder %s1264_s26, 3 }
  0x10   : > { %p1383_p6 = por %p157_p3, %p62_p0  ;;  %s1266_s8 = smov [#allocation5]  }
  0x11   : > { %s1767_s29 = scalar_select %p1378_p4, 1, 0 }
  0x12   : > { %s1768_s30 = scalar_select %p1383_p6, 1, 0 }
  0x13   : > { %p1388_p8 = pnand %p797_p5, %p220_p7  ;;  %s233_s9 = sshll.u32 %s1266_s8, 4  ;;  %s234_s9 = int_to_ptr.vmem [resolvable:$true] %s233_s9 }
  0x14   : > { %s1267_s10 = smov [#allocation7]   ;;  %s1268_s13 = smov [#allocation8]  }
  0x15   : > { %s1769_s7 = scalar_select %p1388_p8, 1, 0 }
  0x16   : > { %p885_p10 = pneg %p1388_p8  ;;  %s244_s11 = sshll.u32 %s1267_s10, 4  ;;  %s1401_s11 = int_to_ptr.vmem [resolvable:$true] %s244_s11 }
  0x17   : > { %s254_s14 = sshll.u32 %s1268_s13, 4  ;;  %s1000_s17 = scalar_lea.hbm %s1754_s1, 16  ;;  %s1403_s14 = int_to_ptr.vmem [resolvable:$true] %s254_s14 }
  0x18   : > { %p1397_p11 = pnand %p885_p10, %p1760_p1  ;;  %p1001_p12 = scmp.ne.s32.totalorder %s1754_s1, %s1000_s17 }
  0x19   : > { %p1007_p5 = scmp.lt.u32.totalorder %s1000_s17, %s1754_s1 }
  0x1a   : > { %p1413_p13 = pneg %p1397_p11 }
  0x1c   : > { %p1003_p0 = pnand %p1413_p13, %p1001_p12 }
  0x1e   : > { %p1004_p3 = pneg %p1003_p0 }
  0x20   : > { %p1009_p7 = pnand %p1007_p5, %p1004_p3 }
  0x22   : > { %1012 = shalt.err (!%p1009_p7)
}
  0x23   : > { %s1013_s13 = scalar_lea.vmem %s234_s9, 16  ;;  %s1020_s15 = scalar_lea.vmem %s234_s9, 32 }
  0x24   : > { %p1014_p10 = scmp.ne.s32.totalorder %s234_s9, %s1013_s13  ;;  %p1021_p2 = scmp.lt.s32.totalorder %s234_s9, %s234_s9 }
  0x25   : > { %p1022_p6 = scmp.lt.s32.totalorder %s1020_s15, %s1013_s13 }
  0x26   : > { %p1016_p9 = pnand %p1014_p10, %p1413_p13 }
  0x27   : > { %p1023_p4 = por %p1022_p6, %p1021_p2 }
  0x28   : > { %p1017_p1 = pneg %p1016_p9 }
  0x2a   : > { %p1024_p8 = pnand %p1023_p4, %p1017_p1 }
  0x2c   : > { %1027 = shalt.err (!%p1024_p8)
}
  0x2d   : > { %888 = dma.hbm_to_vmem [thread:$0]  (!%p1397_p11), %s1754_s1, 16, %s234_s9, [#allocation6]  }
  0x2e   : > { %s1028_s8 = scalar_lea.hbm %s1755_s2, 16 }
  0x2f   : > { %p1029_p9 = scmp.ne.s32.totalorder %s1755_s2, %s1028_s8  ;;  %p1035_p1 = scmp.lt.u32.totalorder %s1028_s8, %s1755_s2 }
  0x31   : > { %p1031_p12 = pnand %p1029_p9, %p1413_p13 }
  0x33   : > { %p1032_p2 = pneg %p1031_p12 }
  0x35   : > { %p1037_p4 = pnand %p1035_p1, %p1032_p2 }
  0x37   : > { %1040 = shalt.err (!%p1037_p4)
}
  0x38   : > { %s1041_s9 = scalar_lea.vmem %s1401_s11, 16  ;;  %s1048_s28 = scalar_lea.vmem %s1401_s11, 32 }
  0x39   : > { %p1042_p6 = scmp.ne.s32.totalorder %s1401_s11, %s1041_s9  ;;  %p1049_p3 = scmp.lt.s32.totalorder %s1401_s11, %s1401_s11 }
  0x3a   : > { %p1050_p5 = scmp.lt.s32.totalorder %s1048_s28, %s1041_s9 }
  0x3b   : > { %p1044_p8 = pnand %p1042_p6, %p1413_p13 }
  0x3c   : > { %p1051_p7 = por %p1050_p5, %p1049_p3 }
  0x3d   : > { %p1045_p0 = pneg %p1044_p8 }
  0x3f   : > { %p1052_p10 = pnand %p1051_p7, %p1045_p0 }
  0x41   : > { %1055 = shalt.err (!%p1052_p10)
}
  0x42   : > { %891 = dma.hbm_to_vmem [thread:$0]  (!%p1397_p11), %s1755_s2, 16, %s1401_s11, [#allocation6]  }
  0x43   : > { %s1056_s8 = scalar_lea.hbm %s1756_s3, 256 }
  0x44   : > { %p1057_p9 = scmp.ne.s32.totalorder %s1756_s3, %s1056_s8  ;;  %p1063_p1 = scmp.lt.u32.totalorder %s1056_s8, %s1756_s3 }
  0x46   : > { %p1059_p12 = pnand %p1057_p9, %p1413_p13 }
  0x48   : > { %p1060_p2 = pneg %p1059_p12 }
  0x4a   : > { %p1065_p4 = pnand %p1063_p1, %p1060_p2 }
  0x4c   : > { %1068 = shalt.err (!%p1065_p4)
}
  0x4d   : > { %s1069_s11 = scalar_lea.vmem %s1403_s14, 256  ;;  %p1077_p3 = scmp.lt.s32.totalorder %s1403_s14, %s1403_s14 }
  0x4e   : > { %p1070_p6 = scmp.ne.s32.totalorder %s1403_s14, %s1069_s11  ;;  %p1078_p5 = scmp.lt.s32.totalorder %s1069_s11, %s1069_s11 }
  0x50   : > { %p1072_p8 = pnand %p1070_p6, %p1413_p13  ;;  %p1079_p7 = por %p1078_p5, %p1077_p3 }
  0x52   : > { %p1073_p0 = pneg %p1072_p8 }
  0x54   : > { %p1080_p10 = pnand %p1079_p7, %p1073_p0 }
  0x56   : > { %1083 = shalt.err (!%p1080_p10)
}
  0x57   : > { %s1269_s28 = smov 64   ;;  %s1270_s20 = smov 4  }
  0x58   : > { %894 = dma.hbm_to_vmem [thread:$0]  (!%p1397_p11), %s1756_s3, 256, %s1403_s14, [#allocation9], %s1269_s28, %s1269_s28, %s1270_s20  }
  0x59   : > { %s49_s17 = sadd.s32 1, %s1252_s23  ;;  %s40_s19 = sadd.s32 1, %s1260_s25 }
  0x5a   : > { %p56_p13 = scmp.ne.s32.totalorder %s1252_s23, %s1248_s22  ;;  %p42_p9 = scmp.ge.s32.totalorder %s40_s19, 2 }
  0x5b   : > { %p57_p12 = scmp.eq.s32.totalorder %s1264_s26, 0  ;;  %p1772_p2 = scmp.eq.s32.totalorder %s1367_s27, 1 }
  0x5c   : > { %p912_p4 = scmp.lt.s32.totalorder %s1264_s26, 2  ;;  %s1793_s19 = smov (%p42_p9, %s40_s19), 0 }
  0x5d   : > { %p1483_p1 = por %p1772_p2, %p56_p13  ;;  %p58_p6 = por %p57_p12, %p56_p13 }
  0x5e   : > { %s268_s12 = sand.u32 1, %s1252_s23   ;;  %s44_s10 = ssub.s32 %s1260_s25, %s1793_s19 }
  0x5f   : > { %p47_p8 = scmp.eq.s32.totalorder %s44_s10, 0  ;;  %s802_s14 = sshll.u32 %s268_s12, 3 }
  0x60   : > { %s803_s13 = sshll.u32 %s1260_s25, 7  ;;  %s1774_s0 = sld [smem:[#allocation19_spill]] }
  0x61   : > { %s1495_s15 = scalar_select %p47_p8, %s1252_s23, %s49_s17  }
  0x62   : > { %s272_s20 = scalar_lea.vmem [#allocation2], %s802_s14  ;;  %p1506_p11 = pnand %p912_p4, %p58_p6 }
  0x63   : > { %s280_s16 = sshll.u32 %s272_s20, 4  ;;  %s269_s17 = scalar_lea.sflag [#allocation3], %s268_s12  ;;  %s1502_s16 = int_to_ptr.vmem [resolvable:$true] %s280_s16 }
  0x64   : > { %p1086_p3 = pneg %p1506_p11 }
  0x66   : > { %s1500_s28 = scalar_lea.hbm %s1774_s0, %s803_s13  ;;  %s1089_s9 = scalar_lea.hbm %s1774_s0, 256 }
  0x67   : > { %s1084_s10 = scalar_lea.hbm %s1500_s28, 128  ;;  %p1090_p10 = scmp.lt.u32.totalorder %s1500_s28, %s1774_s0 }
  0x68   : > { %p1085_p0 = scmp.ne.s32.totalorder %s1500_s28, %s1084_s10  ;;  %p1091_p13 = scmp.lt.u32.totalorder %s1089_s9, %s1084_s10 }
  0x69   : > { %p1093_p12 = scmp.lt.u32.totalorder %s1084_s10, %s1500_s28 }
  0x6a   : > { %p1087_p5 = pnand %p1086_p3, %p1085_p0  ;;  %p1092_p9 = por %p1091_p13, %p1090_p10 }
  0x6c   : > { %p1088_p7 = pneg %p1087_p5  ;;  %p1094_p2 = por %p1093_p12, %p1092_p9 }
  0x6e   : > { %p1095_p4 = pnand %p1094_p2, %p1088_p7 }
  0x70   : > { %1098 = shalt.err (!%p1095_p4)
}
  0x71   : > { %s1099_s12 = scalar_lea.vmem %s1502_s16, 128  ;;  %s1271_s14 = smov [#allocation2]  }
  0x72   : > { %p1100_p6 = scmp.ne.s32.totalorder %s1502_s16, %s1099_s12  ;;  %s1104_s13 = sshll.u32 %s1271_s14, 4  ;;  %s1105_s13 = int_to_ptr.vmem [resolvable:$false] %s1104_s13 }
  0x73   : > { %s1106_s11 = scalar_lea.vmem %s1105_s13, 256  ;;  %p1107_p5 = scmp.lt.s32.totalorder %s1502_s16, %s1105_s13 }
  0x74   : > { %p1102_p8 = pnand %p1100_p6, %p1086_p3  ;;  %p1108_p10 = scmp.lt.s32.totalorder %s1106_s11, %s1099_s12 }
  0x76   : > { %p1103_p0 = pneg %p1102_p8  ;;  %p1109_p13 = por %p1108_p10, %p1107_p5 }
  0x78   : > { %p1110_p9 = pnand %p1109_p13, %p1103_p0 }
  0x7a   : > { %1113 = shalt.err (!%p1110_p9)
}
  0x7b   : > { %898 = dma.hbm_to_vmem [thread:$0]  (!%p1506_p11), %s1500_s28, 128, %s1502_s16, %s269_s17  }
  0x7c   : > { %p1776_p7 = scmp.ne.s32.totalorder %s1769_s7, 0 }
  0x7d   : > { %s1538_s10 = sand.u32 (!%p1776_p7), 1, %s1248_s22   ;;  %p1777_p3 = scmp.ne.s32.totalorder (!%p1776_p7), %s1767_s29, 0 }
  0x7e   : > { %289 = sbr.rel (%p1776_p7) target bundleno = 886 (0x376), region = 36  ;;  %s805_s9 = sshll.u32 (!%p1776_p7), %s1538_s10, 3 }
  0x7f   : > { %s292_s20 = scalar_lea.sflag (!%p1776_p7), [#allocation3], %s1538_s10  ;;  %s295_s12 = scalar_lea.vmem (!%p1776_p7), [#allocation2], %s805_s9 }
  0x85   : > { %1223 = dma.done.wait (%p1777_p3), %s292_s20, 128  }
  0x86   : > { %1225 = vsyncadd (%p1777_p3), %s292_s20, 4294967168  ;;  %p1778_p12 = scmp.eq.s32.totalorder %s1367_s27, 0 }
  0x88   : > { %1227 = dma.done.wait (%p1778_p12), [#allocation6], 32   ;;  %p1779_p11 = pmov %p1778_p12 }
  0x8a   : > { %1229 = vsyncadd (%p1779_p11), [#allocation6], 4294967264  ;;  %p1780_p2 = pmov %p1779_p11 }
  0x8c   : > { %1231 = dma.done.wait (%p1780_p2), [#allocation9], 256   ;;  %p1781_p4 = pmov %p1780_p2 }
  0x8d   : > { %vm348_vm0 = vcmask 261120   ;;  %v347_v0 = vld [vmem:[%s295_s12] sm:$0xff]  ;;  %v996_v7 = vld [vmem:[#allocation8] sm:$0xff]   ;;  %v1272_v8 = vmov 0.0   ;;  %vm1273_vm1 = vmmov 0   ;;  %s1558_s29 = sshll.u32 %s1538_s10, 5 }
  0x8e   : > { %1233 = vsyncadd (%p1781_p4), [#allocation9], 4294967040  ;;  %v349_v1 = vsel %vm348_vm0, %v347_v0, 0.0  ;;  %857 = vmatprep.subr.bf16.mxu0 %v1272_v8  ;;  %861 = vmatprep.mubr.msk.bf16.mxu0 %vm1273_vm1, %v1272_v8  ;;  %v997_v9 = vld [vmem:[#allocation8 + $0x8] sm:$0xff]   ;;  %v812_v14 = vld [vmem:[#allocation5] ss:$0 sm:$0xff] }
  0x8f   : > { %350 = vadd.xlane.f32.xlu0 %v349_v1  ;;  %858 = vmatpush3.bf16.msra.mxu0 %v996_v7  ;;  %v813_v16 = vld [vmem:[#allocation7] ss:$0 sm:$0xff]  ;;  %vm440_vm2 = vcmask 27648   ;;  %s1274_s7 = smov 88   ;;  %s1275_s28 = smov 96  }
  0x90   : > { %859 = vmatprep.subr.bf16.mxu0 %v1272_v8  ;;  %s1561_s16 = scalar_lea.vmem [#allocation10], %s1558_s29  ;;  %s1276_s18 = smov 124  }
  0x91   : > { %s1277_s17 = smov 92   ;;  %s1278_s14 = smov 120  }
  0x92   : > { %s1279_s13 = smov 84   ;;  %s1280_s11 = smov 116  }
  0x93   : > { %860 = vmatpush3.bf16.msra.mxu0 %v997_v9  ;;  %s1281_s9 = smov 80   ;;  %s1282_s20 = smov 112  }
  0x94   : > { %s1283_s12 = smov 76   ;;  %s1286_s0 = smov 104  }
 0x11c   : > { %v351_v2 = vpop.xlane.xlu0 %350 }
 0x11d   : > { %v353_v3 = vmul.f32 0.03125, %v351_v2 }
 0x11f   : > { %v354_v4 = vsub.f32 %v347_v0, %v353_v3 }
 0x121   : > { %v355_v5 = vmul.f32 %v354_v4, %v354_v4 }
 0x123   : > { %v356_v6 = vsel %vm348_vm0, %v355_v5, 0.0 }
 0x124   : > { %357 = vadd.xlane.f32.xlu0 %v356_v6 }
 0x1b1   : > { %v358_v10 = vpop.xlane.xlu0 %357 }
 0x1b2   : > { %v359_v11 = vmul.f32 0.03125, %v358_v10 }
 0x1b4   : > { %v360_v12 = vadd.f32 1e-05, %v359_v11 }
 0x1b6   : > { %998 = vrsqrt.f32 %v360_v12 }
 0x1c0   : > { %v999_v13 = vpop.eup %998 }
 0x1c1   : > { %v362_v15 = vmul.f32 %v999_v13, %v354_v4 }
 0x1c3   : > { %v370_v17 = vmul.f32 %v812_v14, %v362_v15 }
 0x1c5   : > { %v378_v18 = vadd.f32 %v813_v16, %v370_v17 }
 0x1c7   : > { %v379_v19 = vpack.c.bf16 %v378_v18, %v378_v18 }
 0x1c9   : > { %862 = vmatmul.mubr.msk.bf16.vlgmr.msra.gmra.mrb[0].mxu0 %vm348_vm0, %v379_v19 }
 0x29c   : > { %v433_v20 = vpop.f32.mrb[0].mxu0 }
 0x29d   : > { %v439_v21 = vpack.c.bf16 %v433_v20, %v433_v20  ;;  %v863_v22 = vpop.f32.mrb[1].mxu0 }
 0x29e   : > { %v436_v23 = vpop.f32.mrb[2].mxu0 }
 0x29f   : > { %473 = vrot.lane.b32.xlu0 %v439_v21, %s1274_s7  ;;  %445 = vrot.lane.b32.xlu1 %v439_v21, %s1275_s28  ;;  %v864_v24 = vpop.f32.mrb[3].mxu0  ;;  %441 = vst.msk [vmem:[%s1561_s16] sm:$0xf] %vm440_vm2, %v439_v21  ;;  %s1284_s7 = smov 108   ;;  %s1285_s28 = smov 72  }
 0x2a3   : > { %453 = vrot.lane.b32.xlu0 %v439_v21, %s1276_s18  ;;  %458 = vrot.lane.b32.xlu1 %v439_v21, %s1277_s17  ;;  %s1287_s18 = smov 68   ;;  %s1288_s17 = smov 100  }
 0x2a7   : > { %468 = vrot.lane.b32.xlu0 %v439_v21, %s1278_s14  ;;  %488 = vrot.lane.b32.xlu1 %v439_v21, %s1279_s13  ;;  %s1764_s14 = smov 64   ;;  %s1290_s13 = smov 60  }
 0x2ab   : > { %483 = vrot.lane.b32.xlu0 %v439_v21, %s1280_s11  ;;  %503 = vrot.lane.b32.xlu1 %v439_v21, %s1281_s9  ;;  %s1291_s11 = smov 56   ;;  %s1292_s9 = smov 52  }
 0x2af   : > { %498 = vrot.lane.b32.xlu0 %v439_v21, %s1282_s20  ;;  %518 = vrot.lane.b32.xlu1 %v439_v21, %s1283_s12  ;;  %s1293_s20 = smov 48   ;;  %s1294_s12 = smov 44  }
 0x2b3   : > { %513 = vrot.lane.b32.xlu0 %v439_v21, %s1284_s7  ;;  %533 = vrot.lane.b32.xlu1 %v439_v21, %s1285_s28  ;;  %s1296_s7 = smov 36   ;;  %s1567_s28 = scalar_lea.vmem [#allocation11], %s1558_s29 }
 0x2b7   : > { %528 = vrot.lane.b32.xlu0 %v439_v21, %s1286_s0  ;;  %548 = vrot.lane.b32.xlu1 %v439_v21, %s1287_s18  ;;  %s1295_s0 = smov 40   ;;  %s600_s18 = sshll.u32 %s1567_s28, 4  ;;  %s1594_s18 = int_to_ptr.vmem [resolvable:$true] %s600_s18 }
 0x2bb   : > { %543 = vrot.lane.b32.xlu0 %v439_v21, %s1288_s17  ;;  %449 = vrot.lane.b32.xlu1 %v439_v21, %s1764_s14  ;;  %s563_s17 = sand.u32 1, %s1367_s27  }
 0x2bf   : > { %463 = vrot.lane.b32.xlu1 %v439_v21, %s1290_s13  ;;  %s1592_s13 = sshll.u32 %s1256_s24, 9  ;;  %s1613_s24 = scalar_lea.sflag [#allocation12], %s563_s17 }
 0x2c0   : > { %s1605_s27 = scalar_lea.hbm %s1758_s5, %s1592_s13 }
 0x2c3   : > { %478 = vrot.lane.b32.xlu1 %v439_v21, %s1291_s11  ;;  %s583_s11 = sshll.u32 %s1561_s16, 4  ;;  %s1607_s11 = int_to_ptr.vmem [resolvable:$true] %s583_s11 }
 0x2c7   : > { %493 = vrot.lane.b32.xlu1 %v439_v21, %s1292_s9 }
 0x2cb   : > { %508 = vrot.lane.b32.xlu1 %v439_v21, %s1293_s20 }
 0x2cf   : > { %523 = vrot.lane.b32.xlu1 %v439_v21, %s1294_s12  ;;  %s1114_s12 = scalar_lea.vmem %s1594_s18, 512 }
 0x2d0   : > { %p1115_p6 = scmp.ne.s32.totalorder %s1594_s18, %s1114_s12 }
 0x2d2   : > { %p1116_p8 = pnand %p1115_p6, %p1483_p1 }
 0x2d3   : > { %538 = vrot.lane.b32.xlu1 %v439_v21, %s1295_s0  ;;  %s1297_s0 = smov [#allocation11]  }
 0x2d4   : > { %p1117_p0 = pneg %p1116_p8 }
 0x2d7   : > { %553 = vrot.lane.b32.xlu1 %v439_v21, %s1296_s7  ;;  %s1118_s7 = sshll.u32 %s1297_s0, 4  ;;  %s1119_s7 = int_to_ptr.vmem [resolvable:$false] %s1118_s7 }
 0x2d8   : > { %s1120_s9 = scalar_lea.vmem %s1119_s7, 1024  ;;  %p1121_p5 = scmp.lt.s32.totalorder %s1594_s18, %s1119_s7 }
 0x2d9   : > { %p1122_p10 = scmp.lt.s32.totalorder %s1120_s9, %s1114_s12 }
 0x2db   : > { %p1123_p13 = por %p1122_p10, %p1121_p5 }
 0x2dd   : > { %p1124_p9 = pnand %p1123_p13, %p1117_p0 }
 0x311   : > { %v474_v25 = vpop.permute.xlu0 %473  ;;  %v446_v26 = vpop.permute.xlu1 %445 }
 0x312   : > { %822 = vst.msk [vmem:[%s1567_s28 + $0x8] sm:$0xf] %vm440_vm2, %v474_v25  ;;  %448 = vst.msk [vmem:[%s1567_s28] sm:$0xf] %vm440_vm2, %v446_v26 }
 0x315   : > { %v454_v27 = vpop.permute.xlu0 %453  ;;  %v459_v28 = vpop.permute.xlu1 %458 }
 0x316   : > { %818 = vst.msk [vmem:[%s1561_s16 + $0x4] sm:$0xf] %vm440_vm2, %v454_v27  ;;  %819 = vst.msk [vmem:[%s1567_s28 + $0x4] sm:$0xf] %vm440_vm2, %v459_v28 }
 0x319   : > { %v469_v29 = vpop.permute.xlu0 %468  ;;  %v489_v30 = vpop.permute.xlu1 %488 }
 0x31a   : > { %821 = vst.msk [vmem:[%s1561_s16 + $0x8] sm:$0xf] %vm440_vm2, %v469_v29  ;;  %825 = vst.msk [vmem:[%s1567_s28 + $0xc] sm:$0xf] %vm440_vm2, %v489_v30 }
 0x31d   : > { %v484_v31 = vpop.permute.xlu0 %483  ;;  %v504_v32 = vpop.permute.xlu1 %503 }
 0x31e   : > { %824 = vst.msk [vmem:[%s1561_s16 + $0xc] sm:$0xf] %vm440_vm2, %v484_v31  ;;  %828 = vst.msk [vmem:[%s1567_s28 + $0x10] sm:$0xf] %vm440_vm2, %v504_v32 }
 0x321   : > { %v499_v33 = vpop.permute.xlu0 %498  ;;  %v519_v34 = vpop.permute.xlu1 %518 }
 0x322   : > { %827 = vst.msk [vmem:[%s1561_s16 + $0x10] sm:$0xf] %vm440_vm2, %v499_v33  ;;  %831 = vst.msk [vmem:[%s1567_s28 + $0x14] sm:$0xf] %vm440_vm2, %v519_v34 }
 0x325   : > { %v514_v35 = vpop.permute.xlu0 %513  ;;  %v534_v36 = vpop.permute.xlu1 %533 }
 0x326   : > { %830 = vst.msk [vmem:[%s1561_s16 + $0x14] sm:$0xf] %vm440_vm2, %v514_v35  ;;  %834 = vst.msk [vmem:[%s1567_s28 + $0x18] sm:$0xf] %vm440_vm2, %v534_v36 }
 0x329   : > { %v529_v37 = vpop.permute.xlu0 %528  ;;  %v549_v38 = vpop.permute.xlu1 %548 }
 0x32a   : > { %833 = vst.msk [vmem:[%s1561_s16 + $0x18] sm:$0xf] %vm440_vm2, %v529_v37  ;;  %837 = vst.msk [vmem:[%s1567_s28 + $0x1c] sm:$0xf] %vm440_vm2, %v549_v38 }
 0x32b   : > { %1127 = shalt.err (!%p1124_p9)
}
 0x32c   : > { %s1128_s28 = scalar_lea.hbm %s1605_s27, 512  ;;  %s1132_s0 = scalar_lea.hbm %s1758_s5, 1024 }
 0x32d   : > { %p1129_p7 = scmp.ne.s32.totalorder %s1605_s27, %s1128_s28  ;;  %p1133_p11 = scmp.lt.u32.totalorder %s1605_s27, %s1758_s5 }
 0x32e   : > { %p1134_p2 = scmp.lt.u32.totalorder %s1132_s0, %s1128_s28  ;;  %p1136_p6 = scmp.lt.u32.totalorder %s1128_s28, %s1605_s27 }
 0x32f   : > { %p1130_p3 = pnand %p1129_p7, %p1483_p1 }
 0x330   : > { %p1135_p4 = por %p1134_p2, %p1133_p11 }
 0x331   : > { %p1131_p12 = pneg %p1130_p3 }
 0x332   : > { %p1137_p8 = por %p1136_p6, %p1135_p4 }
 0x334   : > { %p1138_p0 = pnand %p1137_p8, %p1131_p12 }
 0x336   : > { %1141 = shalt.err (!%p1138_p0)
}
 0x337   : > { %s1298_s12 = smov 4   ;;  %s1782_s9 = smov 64   ;;  %v544_v39 = vpop.permute.xlu0 %543  ;;  %v450_v40 = vpop.permute.xlu1 %449 }
 0x338   : > { %880 = dma.vmem_to_hbm [thread:$0]  (%p1483_p1), %s1594_s18, 512, %s1605_s27, %s1613_s24, %s1782_s9, %s1782_s9, %s1298_s12  }
 0x339   : > { %s1644_s17 = scalar_lea.hbm %s1757_s4, %s1592_s13  ;;  %836 = vst.msk [vmem:[%s1561_s16 + $0x1c] sm:$0xf] %vm440_vm2, %v544_v39  ;;  %s1649_s20 = scalar_lea.vmem [#allocation13], %s1558_s29 }
 0x33a   : > { %452 = vst.msk [vmem:[%s1649_s20] sm:$0xf] %vm440_vm2, %v450_v40  ;;  %s1142_s7 = scalar_lea.vmem %s1607_s11, 512  ;;  %s1299_s18 = smov [#allocation10]  }
 0x33b   : > { %p1143_p5 = scmp.ne.s32.totalorder %s1607_s11, %s1142_s7  ;;  %s1146_s27 = sshll.u32 %s1299_s18, 4  ;;  %s1147_s27 = int_to_ptr.vmem [resolvable:$false] %s1146_s27 }
 0x33c   : > { %s1148_s14 = scalar_lea.vmem %s1147_s27, 1024  ;;  %p1149_p9 = scmp.lt.s32.totalorder %s1607_s11, %s1147_s27 }
 0x33d   : > { %p1144_p10 = pnand %p1143_p5, %p1483_p1  ;;  %p1150_p7 = scmp.lt.s32.totalorder %s1148_s14, %s1142_s7 }
 0x33f   : > { %p1145_p13 = pneg %p1144_p10  ;;  %p1151_p3 = por %p1150_p7, %p1149_p9 }
 0x341   : > { %p1152_p12 = pnand %p1151_p3, %p1145_p13 }
 0x343   : > { %1155 = shalt.err (!%p1152_p12)
}
 0x344   : > { %s1156_s29 = scalar_lea.hbm %s1644_s17, 512  ;;  %s1160_s18 = scalar_lea.hbm %s1757_s4, 1024 }
 0x345   : > { %p1157_p11 = scmp.ne.s32.totalorder %s1644_s17, %s1156_s29  ;;  %p1161_p6 = scmp.lt.u32.totalorder %s1644_s17, %s1757_s4 }
 0x346   : > { %p1162_p8 = scmp.lt.u32.totalorder %s1160_s18, %s1156_s29  ;;  %p1164_p5 = scmp.lt.u32.totalorder %s1156_s29, %s1644_s17 }
 0x347   : > { %p1158_p2 = pnand %p1157_p11, %p1483_p1 }
 0x348   : > { %p1163_p0 = por %p1162_p8, %p1161_p6 }
 0x349   : > { %p1159_p4 = pneg %p1158_p2 }
 0x34a   : > { %p1165_p10 = por %p1164_p5, %p1163_p0 }
 0x34c   : > { %p1166_p13 = pnand %p1165_p10, %p1159_p4 }
 0x34e   : > { %1169 = shalt.err (!%p1166_p13)
}
 0x34f   : > { %s1783_s7 = scalar_lea.sflag [#allocation4], %s1538_s10  ;;  %v464_v41 = vpop.permute.xlu1 %463  ;;  %s617_s10 = sshll.u32 %s1649_s20, 4  ;;  %s1693_s10 = int_to_ptr.vmem [resolvable:$true] %s617_s10 }
 0x350   : > { %879 = dma.vmem_to_hbm [thread:$0]  (%p1483_p1), %s1607_s11, 512, %s1644_s17, %s1783_s7, %s1782_s9, %s1782_s9, %s1298_s12  }
 0x351   : > { %820 = vst.msk [vmem:[%s1649_s20 + $0x4] sm:$0xf] %vm440_vm2, %v464_v41  ;;  %s1699_s0 = scalar_lea.hbm %s1759_s6, %s1592_s13  ;;  %s1170_s14 = scalar_lea.vmem %s1693_s10, 512 }
 0x352   : > { %p1171_p9 = scmp.ne.s32.totalorder %s1693_s10, %s1170_s14  ;;  %s1300_s29 = smov [#allocation13]  }
 0x353   : > { %v479_v42 = vpop.permute.xlu1 %478  ;;  %s1174_s16 = sshll.u32 %s1300_s29, 4  ;;  %s1175_s16 = int_to_ptr.vmem [resolvable:$false] %s1174_s16 }
 0x354   : > { %823 = vst.msk [vmem:[%s1649_s20 + $0x8] sm:$0xf] %vm440_vm2, %v479_v42  ;;  %p1172_p7 = pnand %p1171_p9, %p1483_p1  ;;  %s1176_s28 = scalar_lea.vmem %s1175_s16, 1024 }
 0x355   : > { %p1177_p12 = scmp.lt.s32.totalorder %s1693_s10, %s1175_s16  ;;  %p1178_p11 = scmp.lt.s32.totalorder %s1176_s28, %s1170_s14 }
 0x356   : > { %p1173_p3 = pneg %p1172_p7 }
 0x357   : > { %v494_v43 = vpop.permute.xlu1 %493  ;;  %p1179_p2 = por %p1178_p11, %p1177_p12 }
 0x358   : > { %826 = vst.msk [vmem:[%s1649_s20 + $0xc] sm:$0xf] %vm440_vm2, %v494_v43 }
 0x359   : > { %p1180_p4 = pnand %p1179_p2, %p1173_p3 }
 0x35b   : > { %v509_v44 = vpop.permute.xlu1 %508 }
 0x35c   : > { %829 = vst.msk [vmem:[%s1649_s20 + $0x10] sm:$0xf] %vm440_vm2, %v509_v44 }
 0x35f   : > { %v524_v45 = vpop.permute.xlu1 %523 }
 0x360   : > { %832 = vst.msk [vmem:[%s1649_s20 + $0x14] sm:$0xf] %vm440_vm2, %v524_v45 }
 0x363   : > { %v539_v46 = vpop.permute.xlu1 %538 }
 0x364   : > { %835 = vst.msk [vmem:[%s1649_s20 + $0x18] sm:$0xf] %vm440_vm2, %v539_v46 }
 0x367   : > { %v554_v47 = vpop.permute.xlu1 %553 }
 0x368   : > { %838 = vst.msk [vmem:[%s1649_s20 + $0x1c] sm:$0xf] %vm440_vm2, %v554_v47 }
 0x369   : > { %1183 = shalt.err (!%p1180_p4)
}
 0x36a   : > { %s1184_s13 = scalar_lea.hbm %s1699_s0, 512  ;;  %s1188_s27 = scalar_lea.hbm %s1759_s6, 1024 }
 0x36b   : > { %p1185_p6 = scmp.ne.s32.totalorder %s1699_s0, %s1184_s13  ;;  %p1189_p5 = scmp.lt.u32.totalorder %s1699_s0, %s1759_s6 }
 0x36c   : > { %p1190_p10 = scmp.lt.u32.totalorder %s1188_s27, %s1184_s13  ;;  %p1192_p9 = scmp.lt.u32.totalorder %s1184_s13, %s1699_s0 }
 0x36d   : > { %p1186_p8 = pnand %p1185_p6, %p1483_p1 }
 0x36e   : > { %p1191_p13 = por %p1190_p10, %p1189_p5 }
 0x36f   : > { %p1187_p0 = pneg %p1186_p8 }
 0x370   : > { %p1193_p7 = por %p1192_p9, %p1191_p13 }
 0x372   : > { %p1194_p3 = pnand %p1193_p7, %p1187_p0 }
 0x374   : > { %1197 = shalt.err (!%p1194_p3)
}
 0x375   : > { %881 = dma.vmem_to_hbm [thread:$0]  (%p1483_p1), %s1693_s10, 512, %s1699_s0, %s1613_s24, %s1782_s9, %s1782_s9, %s1298_s12  }
 0x376 PF: > { %s632_s17 = sand.u32 1, %s1244_s21   ;;  %p1784_p12 = scmp.ne.s32.totalorder %s1768_s30, 0 }
 0x377   : > { %p1785_p11 = scmp.ge.s32.totalorder %s1264_s26, 2  ;;  %s633_s14 = scalar_lea.sflag [#allocation4], %s632_s17 }
 0x379   : > { %p900_p2 = pnand %p1785_p11, %p1784_p12 }
 0x37b   : > { %1235 = dma.done.wait (!%p900_p2), %s633_s14, 512  }
 0x37c   : > { %1237 = vsyncadd (!%p900_p2), %s633_s14, 4294966784  ;;  %s1786_s8 = sadd.s32 4294967294, %s1264_s26  }
 0x37d   : > { %s641_s29 = sand.u32 1, %s1786_s8  }
 0x37e   : > { %s642_s16 = scalar_lea.sflag [#allocation12], %s641_s29 }
 0x37f   : > { %1239 = dma.done.wait (!%p900_p2), %s642_s16, 1024  }
 0x380   : > { %1241 = vsyncadd (!%p900_p2), %s642_s16, 4294966272  ;;  %s28_s26 = sadd.s32 1, %s1264_s26   ;;  %s1787_s21 = smov %s1248_s22 }
 0x381   : > { %p25_p1 = scmp.ge.s32.totalorder %s28_s26, 4   ;;  %s1788_s22 = smov %s1252_s23 }
 0x382   : > { %s1789_s23 = smov %s1495_s15  ;;  %s1790_s24 = smov %s1260_s25 }
 0x383   : > { %s1791_s25 = smov %s1793_s19  ;;  %27 = sbr.rel (!%p25_p1) target bundleno = 12 (0xc), region = 146 }
 0x38a   :  { %656 = vsyncpa [#allocation3], 1 }
 0x38b   :  { %658 = vsyncpa [#allocation3 + $0x1], 1 }
 0x38c   :  { %659 = vsyncpa [#allocation6], 1 }
 0x38d   :  { %660 = vsyncpa [#allocation9], 1 }
 0x38e   :  { %661 = vsyncpa [#allocation4], 1 }
 0x38f   :  { %663 = vsyncpa [#allocation4 + $0x1], 1 }
 0x390   :  { %664 = vsyncpa [#allocation12], 1 }
 0x391   :  { %666 = vsyncpa [#allocation12 + $0x1], 1 }

</bundles_post_ra>
